<compile_context>
chip_gen: v5e
topology: v5e:2x2
jax: 0.10.0
libtpu: 0.0.40
codegen_flags: <defaults>
</compile_context>

<pallas_src>
import functools

import jax
import jax.numpy as jnp
from jax.experimental import pallas as pl
from jax.experimental.pallas import tpu as pltpu

LANE = 128                 # vreg lane width
SUBLANE = 8                # vreg sublane count (f32)
CHUNK = SUBLANE * LANE     # 1024 elements = one f32 (8,128) vreg


@functools.lru_cache(maxsize=1)
def _chip_defaults():
    """(ncores, max_tile_rows, vmem_limit_bytes) by TPU generation.

    v7x: 2 TensorCores/chip, 64 MiB VMEM/TC, ~3.2 TB/s HBM -> bigger tiles to
    amortize the ~0.35 us per-grid-step overhead, but capped at 12288 rows so
    2 inputs x 2 pipeline buffers x 6 MiB (+ elementwise temporaries) stays
    safely under the 64 MiB physical ceiling.
    v5e/v6e: single TC, 128 MiB physical VMEM -> 8192-row tiles; the scoped
    VMEM limit is raised explicitly (v5e default is only 16 MiB).
    """
    kind = ""
    try:
        kind = jax.devices()[0].device_kind.lower()
    except Exception:
        pass
    if "7" in kind:                      # TPU v7x family
        return 2, 12288, 48 << 20
    return 1, 8192, 48 << 20             # v5e / v6e / unknown (conservative)


def _round_up(x, m):
    return ((x + m - 1) // m) * m


def _plan_split(rows, ncores, max_tile_rows):
    """Pick (ncores_eff, blocks_per_core, tile_rows).

    Guarantees:
      * total_blocks == ncores_eff * blocks_per_core exactly (no clamped index
        map, no redundant DMA of the last block on the second core),
      * every block's start row is in bounds, so at most the *last* block is
        partial and the ragged-row mask runs on at most one grid step.
    Falls back to fewer cores for tensors too small to split evenly.
    """
    for nc in range(ncores, 0, -1):
        bpc = max(1, pl.cdiv(rows, nc * max_tile_rows))
        tile_rows = min(max_tile_rows, _round_up(pl.cdiv(rows, nc * bpc), SUBLANE))
        total = nc * bpc
        if (total - 1) * tile_rows < rows:   # every block overlaps real rows
            return nc, bpc, tile_rows
    return 1, 1, min(max_tile_rows, rows)    # unreachable for rows >= SUBLANE


def _sq_sum_kernel(p_ref, t_ref, o_ref, *, tile_rows, blocks_per_core,
                   total_blocks, valid_rows, need_mask):
    """Accumulate sum((p - t)^2) of this core's row range into an (8,128) block."""
    c = pl.program_id(0)   # core axis ("parallel")
    j = pl.program_id(1)   # reduction axis ("arbitrary")

    @pl.when(j == 0)
    def _():
        o_ref[...] = jnp.zeros_like(o_ref)

    d = p_ref[...].astype(jnp.float32) - t_ref[...].astype(jnp.float32)
    sq = d * d

    def fold(x):
        # (tile_rows,128) -> (tile_rows/8, 8, 128) -> sum over the leading dim:
        # pure VPU adds into the vreg-shaped accumulator, no cross-lane reduce
        # and no narrow scalar store in the steady state.
        return jnp.sum(x.reshape(tile_rows // SUBLANE, SUBLANE, LANE), axis=0)

    if need_mask:
        # Only the very last block can be partial (guaranteed by _plan_split);
        # pay for the iota/compare/select on exactly that one grid step.
        is_last = (c * blocks_per_core + j) == (total_blocks - 1)

        @pl.when(is_last)
        def _():
            row = jax.lax.broadcasted_iota(jnp.int32, (tile_rows, LANE), 0)
            global_row = (total_blocks - 1) * tile_rows + row
            # Mask AFTER the square: padded rows may hold garbage (even NaN);
            # the select throws them away before they reach the accumulator.
            o_ref[...] += fold(jnp.where(global_row < valid_rows, sq, 0.0))

        @pl.when(jnp.logical_not(is_last))
        def _():
            o_ref[...] += fold(sq)
    else:
        o_ref[...] += fold(sq)


def _sq_sum_pallas(pred, target, *, max_tile_rows=None):
    """sum((pred - target)^2) over all elements, accumulated in f32."""
    n = pred.size
    flat_p = pred.reshape(-1)
    flat_t = target.reshape(-1)

    main_n = (n // CHUNK) * CHUNK
    tail = jnp.float32(0.0)
    if main_n < n:
        # Ragged tail (< 1024 elements): plain JAX, so the big tensors are never
        # padded (padding would be an extra full HBM read+write of both inputs).
        dt = flat_p[main_n:].astype(jnp.float32) - flat_t[main_n:].astype(jnp.float32)
        tail = jnp.sum(dt * dt)
    if main_n == 0:
        return tail

    ncores_hw, default_tile, vmem_limit = _chip_defaults()
    if max_tile_rows is None:
        max_tile_rows = default_tile

    rows = main_n // LANE                      # multiple of SUBLANE
    ncores, bpc, tile_rows = _plan_split(rows, ncores_hw, max_tile_rows)
    total_blocks = ncores * bpc
    need_mask = total_blocks * tile_rows != rows   # only the last block is partial

    # No dtype cast, no pad: lane-dense (rows, 128) view of the leading slice.
    p2d = flat_p[:main_n].reshape(rows, LANE)
    t2d = flat_t[:main_n].reshape(rows, LANE)

    def in_map(c, j):
        return (c * bpc + j, 0)    # contiguous, never clamped -> no redundant DMA

    kernel = functools.partial(
        _sq_sum_kernel,
        tile_rows=tile_rows,
        blocks_per_core=bpc,
        total_blocks=total_blocks,
        valid_rows=rows,
        need_mask=need_mask,
    )

    partials = pl.pallas_call(
        kernel,
        out_shape=jax.ShapeDtypeStruct((ncores * SUBLANE, LANE), jnp.float32),
        grid_spec=pltpu.PrefetchScalarGridSpec(
            num_scalar_prefetch=0,
            grid=(ncores, bpc),
            in_specs=[
                pl.BlockSpec((tile_rows, LANE), in_map),   # preds tile
                pl.BlockSpec((tile_rows, LANE), in_map),   # targets tile
            ],
            # Per-core (8,128) accumulator block, resident across the reduction axis.
            out_specs=pl.BlockSpec((SUBLANE, LANE), lambda c, j: (c, 0)),
        ),
        compiler_params=pltpu.CompilerParams(
            # TODO(synk): if xprof on v7x shows only one TensorCore active,
            # switch axis 0 to pltpu.CORE_PARALLEL; plain "parallel" is kept
            # here because it is known-good on single-TC v5e/v6e.
            # TODO(synk): optional sweep: pipeline_mode=pl.Buffered(3) on the
            # input specs if DMA gaps remain exposed at grid-step boundaries.
            dimension_semantics=("parallel", "arbitrary"),
            vmem_limit_bytes=vmem_limit,
        ),
    )(p2d, t2d)

    # Cross-lane/cross-core reduce of at most 2x(8,128) partials in plain JAX.
    # TODO(synk): for >1e8-element tensors a pairwise/tree combine of per-tile
    # sums would tighten f32 accumulation drift vs the PyTorch reference.
    return jnp.sum(partials) + tail


@jax.jit
def _weighted_mse_pallas(pred, target, weight_scalar):
    """err = mean(weight * (pred - target)^2); the reduction runs in the Pallas kernel."""
    # TODO(synk): assumes a *scalar* per-item weight (matches BaseLoss default
    # `new_ones(1)`); an elementwise weight tensor would need to be streamed
    # through the kernel instead of applied here.
    total = _sq_sum_pallas(pred, target)
    w = jnp.asarray(weight_scalar, jnp.float32).reshape(())
    return w * total / jnp.float32(pred.size)


def base_loss_forward(preds, targets, weight=None):
    """Mirror of BaseLoss.forward semantics (list-of-tensors or single tensor)."""
    # TODO(synk): BaseLoss._forward is abstract in the reference module; weighted MSE
    # is used as the concrete per-item loss here.
    # TODO(synk): the list path could be fused into one pallas_call (scalar-prefetch
    # per-item row offsets + weights) to amortize per-item launch/pipeline warm-up;
    # kept as per-item calls here since items may have arbitrary, distinct shapes.
    if isinstance(preds, (list, tuple)):
        N = len(preds)
        if weight is None:
            weight = jnp.ones((N,), dtype=jnp.float32)
        weight = jnp.asarray(weight, jnp.float32).reshape(-1)
        errs = [_weighted_mse_pallas(preds[n], targets[n], weight[n]) for n in range(N)]
        return jnp.mean(jnp.stack(errs))
    else:
        if weight is None:
            w0 = jnp.float32(1.0)
        else:
            w = jnp.asarray(weight, jnp.float32)
            w0 = w if w.ndim == 0 else w.reshape(-1)[0]
        return _weighted_mse_pallas(preds, targets, w0)


if __name__ == "__main__":
    key = jax.random.PRNGKey(0)
    k1, k2, k3, k4, k5, k6, k7, k8 = jax.random.split(key, 8)

    # Single-tensor case (NCHW), numel divisible by 1024 -> pure kernel path.
    x = jax.random.normal(k1, (2, 4, 16, 16), dtype=jnp.float32)
    y = jax.random.normal(k2, (2, 4, 16, 16), dtype=jnp.float32)
    err_single = base_loss_forward(x, y)  # weight defaults to ones

    # List case with explicit per-item weights.
    p_list = [x, jax.random.normal(k3, (2, 4, 16, 16), dtype=jnp.float32)]
    t_list = [y, jax.random.normal(k4, (2, 4, 16, 16), dtype=jnp.float32)]
    w = jnp.array([0.5, 2.0], dtype=jnp.float32)
    err_list = base_loss_forward(p_list, t_list, w)

    # Ragged case (numel not divisible by 1024): exercises the plain-JAX tail path.
    xr = jax.random.normal(k5, (1, 3, 24, 24), dtype=jnp.float32)
    yr = jax.random.normal(k6, (1, 3, 24, 24), dtype=jnp.float32)
    err_ragged = base_loss_forward(xr, yr)

    # Multi-block + masked-last-block path at a small shape, forced via a tiny
    # tile override (otherwise it would need a >1M-element tensor to trigger).
    xm = jax.random.normal(k7, (2, 4, 41, 41), dtype=jnp.float32)
    ym = jax.random.normal(k8, (2, 4, 41, 41), dtype=jnp.float32)
    mse_multiblock = jax.jit(
        lambda a, b: _sq_sum_pallas(a, b, max_tile_rows=64) / a.size
    )(xm, ym)

    jax.block_until_ready((err_single, err_list, err_ragged, mse_multiblock))

    # Cross-check against plain-JAX references.
    ref_single = jnp.mean((x - y) ** 2)
    ref_list = jnp.mean(
        jnp.stack([jnp.mean(w[i] * (p_list[i] - t_list[i]) ** 2) for i in range(2)])
    )
    ref_ragged = jnp.mean((xr - yr) ** 2)
    ref_multiblock = jnp.mean((xm - ym) ** 2)
    assert jnp.allclose(err_single, ref_single, rtol=1e-5, atol=1e-6)
    assert jnp.allclose(err_list, ref_list, rtol=1e-5, atol=1e-6)
    assert jnp.allclose(err_ragged, ref_ragged, rtol=1e-5, atol=1e-6)
    assert jnp.allclose(mse_multiblock, ref_multiblock, rtol=1e-4, atol=1e-6)

    print("KERNEL_OK")
</pallas_src>

<mosaic_0001>
module attributes {stable_mosaic.version = 11 : i64} {
  func.func @_sq_sum_kernel(%arg0: i32, %arg1: i32, %arg2: memref<16x128xf32, #tpu.memory_space<vmem>>, %arg3: memref<16x128xf32, #tpu.memory_space<vmem>>, %arg4: memref<8x128xf32, #tpu.memory_space<vmem>>) attributes {dimension_semantics = [#tpu.dimension_semantics<parallel>, #tpu.dimension_semantics<arbitrary>], iteration_bounds = array<i64: 1, 1>, scalar_prefetch = 0 : i64, scratch_operands = 0 : i64, tpu.core_type = #tpu.core_type<tc>, window_params = [{transform_indices = @transform_0, window_bounds = array<i64: 16, 128>}, {transform_indices = @transform_1, window_bounds = array<i64: 16, 128>}, {transform_indices = @transform_2, window_bounds = array<i64: 8, 128>}]} {
    %c0_i32 = arith.constant 0 : i32
    %0 = arith.cmpi eq, %arg1, %c0_i32 : i32
    %1 = arith.extui %0 : i1 to i32
    %c0_i32_0 = arith.constant 0 : i32
    %2 = arith.cmpi ne, %1, %c0_i32_0 : i32
    scf.if %2 {
      %cst_8 = arith.constant 0.000000e+00 : f32
      %12 = vector.broadcast %cst_8 : f32 to vector<8x128xf32>
      %c0_9 = arith.constant 0 : index
      %c0_10 = arith.constant 0 : index
      %13 = vector.load %arg4[%c0_9, %c0_10] : memref<8x128xf32, #tpu.memory_space<vmem>>, vector<8x128xf32>
      tpu.vector_store %arg4[%c0_9, %c0_10], %12 {strides = array<i32>} : memref<8x128xf32, #tpu.memory_space<vmem>>, vector<8x128xf32>,
    } else {
    }
    %c0 = arith.constant 0 : index
    %c0_1 = arith.constant 0 : index
    %3 = vector.load %arg2[%c0, %c0_1] : memref<16x128xf32, #tpu.memory_space<vmem>>, vector<16x128xf32>
    %c0_2 = arith.constant 0 : index
    %c0_3 = arith.constant 0 : index
    %4 = vector.load %arg3[%c0_2, %c0_3] : memref<16x128xf32, #tpu.memory_space<vmem>>, vector<16x128xf32>
    %5 = arith.subf %3, %4 : vector<16x128xf32>
    %6 = arith.mulf %5, %5 : vector<16x128xf32>
    %c0_4 = arith.constant 0 : index
    %c0_5 = arith.constant 0 : index
    %7 = vector.load %arg4[%c0_4, %c0_5] : memref<8x128xf32, #tpu.memory_space<vmem>>, vector<8x128xf32>
    %8 = vector.shape_cast %6 : vector<16x128xf32> to vector<2x8x128xf32>
    %cst = arith.constant dense<0.000000e+00> : vector<8x128xf32>
    %9 = vector.multi_reduction <add>, %8, %cst [0] : vector<2x8x128xf32> to vector<8x128xf32>
    %10 = arith.addf %7, %9 : vector<8x128xf32>
    %c0_6 = arith.constant 0 : index
    %c0_7 = arith.constant 0 : index
    %11 = vector.load %arg4[%c0_6, %c0_7] : memref<8x128xf32, #tpu.memory_space<vmem>>, vector<8x128xf32>
    tpu.vector_store %arg4[%c0_6, %c0_7], %10 {strides = array<i32>} : memref<8x128xf32, #tpu.memory_space<vmem>>, vector<8x128xf32>,
    return
  }
  func.func @transform_0(%arg0: i32, %arg1: i32) -> (i32, i32) {
    %c1_i32 = arith.constant 1 : i32
    %0 = arith.muli %arg0, %c1_i32 : i32
    %1 = arith.addi %0, %arg1 : i32
    %c0_i32 = arith.constant 0 : i32
    %c0_i32_0 = arith.constant 0 : i32
    return %1, %c0_i32 : i32, i32
  }
  func.func @transform_1(%arg0: i32, %arg1: i32) -> (i32, i32) {
    %c1_i32 = arith.constant 1 : i32
    %0 = arith.muli %arg0, %c1_i32 : i32
    %1 = arith.addi %0, %arg1 : i32
    %c0_i32 = arith.constant 0 : i32
    %c0_i32_0 = arith.constant 0 : i32
    return %1, %c0_i32 : i32, i32
  }
  func.func @transform_2(%arg0: i32, %arg1: i32) -> (i32, i32) {
    %c0_i32 = arith.constant 0 : i32
    %c0_i32_0 = arith.constant 0 : i32
    return %arg0, %c0_i32 : i32, i32
  }
}

</mosaic_0001>

<bundles_post_ra>
// kernel: _weighted_mse_pallas.1
= control target key start
LH: loop header
LB: loop body
LE: loop exit
PB: predicated region body
PF: predicated region fallthrough
CT: control target
= control target key end

     0   :  { %s119_s0 = inlined_call_operand.vmem [shape: f32[16,128], index: 0, kind: input, shape index: {}]   ;;  %s120_s1 = inlined_call_operand.vmem [shape: f32[16,128], index: 1, kind: input, shape index: {}]   ;;  %s121_s2 = inlined_call_operand.vmem [shape: f32[8,128], index: 2, kind: output, shape index: {}]  }
   0x1   :  { %v60_v0 = vld [vmem:[%s119_s0] sm:$0xff]  ;;  %v61_v1 = vld [vmem:[%s119_s0 + $0x8] sm:$0xff] }
   0x2   :  { %v62_v2 = vld [vmem:[%s120_s1] sm:$0xff]  ;;  %v63_v3 = vld [vmem:[%s120_s1 + $0x8] sm:$0xff] }
   0x3   :  { %v64_v4 = vsub.f32 %v60_v0, %v62_v2  ;;  %v65_v5 = vsub.f32 %v61_v1, %v63_v3 }
   0x5   :  { %v66_v6 = vmul.f32 %v64_v4, %v64_v4  ;;  %v67_v7 = vmul.f32 %v65_v5, %v65_v5 }
   0x7   :  { %v69_v8 = vadd.f32 %v67_v7, %v66_v6 }
   0x9   :  { %71 = vst [vmem:[%s121_s2] sm:$0xff] %v69_v8 }

</bundles_post_ra>
